<compile_context>
chip_gen: v7x
topology: tpu7x:2x2x1
jax: 0.10.0
libtpu: 0.0.40
codegen_flags: <defaults>
</compile_context>

<pallas_src>
import functools

import jax
import jax.numpy as jnp
from jax.experimental import pallas as pl
from jax.experimental.pallas import tpu as pltpu


def _se_kernel(x_ref, w1t_ref, w2t_ref, o_ref, *, inv_hw):
    # x_ref  : (B, C, HW)  in the input dtype (no full-tile HBM copies)
    # w1t_ref: (C, Cr)     fc1 weight, pre-transposed in the wrapper
    # w2t_ref: (Cr, C)     fc2 weight, pre-transposed in the wrapper
    # o_ref  : (B, C, HW)
    x = x_ref[...]

    # --- squeeze: global average pool over the lane (spatial) axis, f32 acc.
    pooled = jnp.sum(x.astype(jnp.float32), axis=-1) * inv_hw      # (B, C) f32

    # --- excite: batched fc1 -> relu -> fc2 -> hard sigmoid (all (B,*)-sized)
    y1 = jnp.dot(pooled, w1t_ref[...],
                 preferred_element_type=jnp.float32)               # (B, Cr)
    y1 = jnp.maximum(y1, 0.0)
    y2 = jnp.dot(y1, w2t_ref[...],
                 preferred_element_type=jnp.float32)               # (B, C)
    scale = jnp.clip(y2 + 3.0, 0.0, 6.0) * (1.0 / 6.0)             # hard sigmoid

    # --- scale: broadcast multiply in the input dtype; only `scale` is cast.
    o_ref[...] = x * scale.astype(x.dtype)[:, :, None]


def _pick_block_batch(n, per_example_bytes, budget_bytes):
    """Largest divisor of n whose 2-in + 2-out double-buffered tiles fit the
    budget, preferring >=2 grid steps so dual-TC chips (v7x) get parallel work."""
    max_b = max(1, budget_bytes // (4 * per_example_bytes))
    divisors = [d for d in range(1, n + 1) if n % d == 0]
    fitting = [d for d in divisors if d <= max_b] or [1]
    b = fitting[-1]
    if n >= 2:
        while b > 1 and n // b < 2:
            smaller = [d for d in fitting if d < b]
            b = smaller[-1] if smaller else 1
    return b


def se_module(x_nchw, w1, w2):
    """x_nchw: (N, C, H, W); w1: (C//r, C); w2: (C, C//r) (PyTorch Linear layout)."""
    N, C, H, W = x_nchw.shape
    HW = H * W
    Cr = w1.shape[0]
    itemsize = jnp.dtype(x_nchw.dtype).itemsize

    # No host/XLA padding of x: the last two block dims equal the full array
    # extents, which is always a legal TPU block shape, and keeps HBM traffic
    # at exactly one read + one write of x.
    x_flat = x_nchw.reshape(N, C, HW)

    # VMEM footprint per example uses the *internal* padded layout
    # (sublane multiple of 8, lane multiple of 128).
    c_pad = ((C + 7) // 8) * 8
    hw_pad = ((HW + 127) // 128) * 128
    per_example_bytes = c_pad * hw_pad * itemsize
    B = _pick_block_batch(N, per_example_bytes, budget_bytes=32 * 1024 * 1024)
    grid = (N // B,)

    # Pre-transpose the (tiny) weights once in XLA so the kernel does plain
    # row-major dots; they are re-used across all grid steps (constant index).
    w1t = w1.T  # (C, Cr)
    w2t = w2.T  # (Cr, C)

    kernel = functools.partial(_se_kernel, inv_hw=1.0 / HW)

    w_bytes = (w1.size + w2.size) * jnp.dtype(w1.dtype).itemsize
    cost = pl.CostEstimate(
        flops=2 * N * C * HW + 4 * N * C * Cr,
        transcendentals=0,
        bytes_accessed=2 * N * C * HW * itemsize + w_bytes,
    )

    out_flat = pl.pallas_call(
        kernel,
        out_shape=jax.ShapeDtypeStruct((N, C, HW), x_nchw.dtype),
        grid_spec=pltpu.PrefetchScalarGridSpec(
            num_scalar_prefetch=0,
            grid=grid,
            in_specs=[
                pl.BlockSpec((B, C, HW), lambda b: (b, 0, 0)),
                pl.BlockSpec((C, Cr), lambda b: (0, 0)),
                pl.BlockSpec((Cr, C), lambda b: (0, 0)),
            ],
            out_specs=pl.BlockSpec((B, C, HW), lambda b: (b, 0, 0)),
        ),
        compiler_params=pltpu.CompilerParams(
            dimension_semantics=("parallel",),
            vmem_limit_bytes=48 * 1024 * 1024,
        ),
        cost_estimate=cost,
    )(x_flat, w1t, w2t)

    return out_flat.reshape(N, C, H, W)


def se_module_ref(x, w1, w2):
    """Pure-JAX reference mirroring the PyTorch forward."""
    y = jnp.mean(x, axis=(2, 3))                 # (N, C)
    y = jnp.maximum(y @ w1.T, 0.0)               # (N, Cr)
    y = y @ w2.T                                 # (N, C)
    y = jnp.clip(y + 3.0, 0.0, 6.0) / 6.0        # hard sigmoid
    return x * y[:, :, None, None]


if __name__ == "__main__":
    # SEModule(in_channels_num=8, reduction_ratio=4)
    N, C, H, W = 2, 8, 16, 16
    R = 4
    Cr = C // R

    key = jax.random.PRNGKey(0)
    kx, k1, k2 = jax.random.split(key, 3)
    x = jax.random.normal(kx, (N, C, H, W), dtype=jnp.float32)
    # Deterministic synthetic weights (PyTorch Linear layout: (out, in)).
    w1 = jax.random.normal(k1, (Cr, C), dtype=jnp.float32) * 0.3
    w2 = jax.random.normal(k2, (C, Cr), dtype=jnp.float32) * 0.3

    out = se_module(x, w1, w2)
    out = jax.block_until_ready(out)

    ref = se_module_ref(x, w1, w2)
    assert out.shape == (N, C, H, W)
    assert jnp.allclose(out, ref, atol=1e-5, rtol=1e-5)

    print("KERNEL_OK")
</pallas_src>

<mosaic_0001>
module attributes {stable_mosaic.version = 11 : i64} {
  func.func @_se_kernel(%arg0: i32, %arg1: memref<1x8x256xf32, #tpu.memory_space<vmem>>, %arg2: memref<8x2xf32, #tpu.memory_space<vmem>>, %arg3: memref<2x8xf32, #tpu.memory_space<vmem>>, %arg4: memref<1x8x256xf32, #tpu.memory_space<vmem>>) attributes {dimension_semantics = [#tpu.dimension_semantics<parallel>], iteration_bounds = array<i64: 2>, scalar_prefetch = 0 : i64, scratch_operands = 0 : i64, tpu.core_type = #tpu.core_type<tc>, window_params = [{transform_indices = @transform_0, window_bounds = array<i64: 1, 8, 256>}, {pipeline_mode = #tpu.pipeline_mode<synchronous>, transform_indices = @transform_1, window_bounds = array<i64: 8, 2>}, {pipeline_mode = #tpu.pipeline_mode<synchronous>, transform_indices = @transform_2, window_bounds = array<i64: 2, 8>}, {transform_indices = @transform_3, window_bounds = array<i64: 1, 8, 256>}]} {
    %c0 = arith.constant 0 : index
    %c0_0 = arith.constant 0 : index
    %c0_1 = arith.constant 0 : index
    %0 = vector.load %arg1[%c0, %c0_0, %c0_1] : memref<1x8x256xf32, #tpu.memory_space<vmem>>, vector<1x8x256xf32>
    %cst = arith.constant dense<0.000000e+00> : vector<1x8xf32>
    %1 = vector.multi_reduction <add>, %0, %cst [2] : vector<1x8x256xf32> to vector<1x8xf32>
    %cst_2 = arith.constant 3.906250e-03 : f32
    %2 = vector.broadcast %cst_2 : f32 to vector<1x8xf32>
    %3 = arith.mulf %1, %2 : vector<1x8xf32>
    %c0_3 = arith.constant 0 : index
    %c0_4 = arith.constant 0 : index
    %4 = vector.load %arg2[%c0_3, %c0_4] : memref<8x2xf32, #tpu.memory_space<vmem>>, vector<8x2xf32>
    %cst_5 = arith.constant dense<0.000000e+00> : vector<1x2xf32>
    %5 = tpu.matmul %3, %4, %cst_5 {dimension_numbers = #tpu.dot_dimension_numbers<[1], [0], [0], [1], [0, 0, 1, 1], [], []>} : vector<1x8xf32>, vector<8x2xf32>, vector<1x2xf32> -> vector<1x2xf32>
    %cst_6 = arith.constant 0.000000e+00 : f32
    %6 = vector.broadcast %cst_6 : f32 to vector<1x2xf32>
    %7 = arith.maximumf %5, %6 : vector<1x2xf32>
    %c0_7 = arith.constant 0 : index
    %c0_8 = arith.constant 0 : index
    %8 = vector.load %arg3[%c0_7, %c0_8] : memref<2x8xf32, #tpu.memory_space<vmem>>, vector<2x8xf32>
    %cst_9 = arith.constant dense<0.000000e+00> : vector<1x8xf32>
    %9 = tpu.matmul %7, %8, %cst_9 {dimension_numbers = #tpu.dot_dimension_numbers<[1], [0], [0], [1], [0, 0, 1, 1], [], []>} : vector<1x2xf32>, vector<2x8xf32>, vector<1x8xf32> -> vector<1x8xf32>
    %cst_10 = arith.constant 3.000000e+00 : f32
    %10 = vector.broadcast %cst_10 : f32 to vector<1x8xf32>
    %11 = arith.addf %9, %10 : vector<1x8xf32>
    %cst_11 = arith.constant 0.000000e+00 : f32
    %cst_12 = arith.constant 6.000000e+00 : f32
    %12 = vector.broadcast %cst_11 : f32 to vector<1x8xf32>
    %13 = arith.maximumf %12, %11 : vector<1x8xf32>
    %14 = vector.broadcast %cst_12 : f32 to vector<1x8xf32>
    %15 = arith.minimumf %14, %13 : vector<1x8xf32>
    %cst_13 = arith.constant 0.166666672 : f32
    %16 = vector.broadcast %cst_13 : f32 to vector<1x8xf32>
    %17 = arith.mulf %15, %16 : vector<1x8xf32>
    %18 = vector.shape_cast %17 : vector<1x8xf32> to vector<1x8x1xf32>
    %19 = vector.broadcast %18 : vector<1x8x1xf32> to vector<1x8x256xf32>
    %20 = arith.mulf %0, %19 : vector<1x8x256xf32>
    %c0_14 = arith.constant 0 : index
    %c0_15 = arith.constant 0 : index
    %c0_16 = arith.constant 0 : index
    %21 = vector.load %arg4[%c0_14, %c0_15, %c0_16] : memref<1x8x256xf32, #tpu.memory_space<vmem>>, vector<1x8x256xf32>
    tpu.vector_store %arg4[%c0_14, %c0_15, %c0_16], %20 {strides = array<i32>} : memref<1x8x256xf32, #tpu.memory_space<vmem>>, vector<1x8x256xf32>,
    return
  }
  func.func @transform_0(%arg0: i32) -> (i32, i32, i32) {
    %c0_i32 = arith.constant 0 : i32
    %c0_i32_0 = arith.constant 0 : i32
    %c0_i32_1 = arith.constant 0 : i32
    return %arg0, %c0_i32, %c0_i32_0 : i32, i32, i32
  }
  func.func @transform_1(%arg0: i32) -> (i32, i32) {
    %c0_i32 = arith.constant 0 : i32
    %c0_i32_0 = arith.constant 0 : i32
    %c0_i32_1 = arith.constant 0 : i32
    return %c0_i32, %c0_i32_0 : i32, i32
  }
  func.func @transform_2(%arg0: i32) -> (i32, i32) {
    %c0_i32 = arith.constant 0 : i32
    %c0_i32_0 = arith.constant 0 : i32
    %c0_i32_1 = arith.constant 0 : i32
    return %c0_i32, %c0_i32_0 : i32, i32
  }
  func.func @transform_3(%arg0: i32) -> (i32, i32, i32) {
    %c0_i32 = arith.constant 0 : i32
    %c0_i32_0 = arith.constant 0 : i32
    %c0_i32_1 = arith.constant 0 : i32
    return %arg0, %c0_i32, %c0_i32_0 : i32, i32, i32
  }
}

</mosaic_0001>

<bundles_post_ra>
// kernel: tpu_custom_call.1
= control target key start
LH: loop header
LB: loop body
LE: loop exit
PB: predicated region body
PF: predicated region fallthrough
CT: control target
= control target key end

     0   :  { %8 = vsyncpa [#allocation3], 0  ;;  %s827_s0 = inlined_call_operand.hbm [shape: f32[2,8,256], index: 0, kind: input, shape index: {}]   ;;  %s828_s1 = inlined_call_operand.vmem [shape: f32[8,2], index: 1, kind: input, shape index: {}]   ;;  %s829_s2 = inlined_call_operand.vmem [shape: f32[2,8], index: 2, kind: input, shape index: {}]   ;;  %s830_s3 = inlined_call_operand.hbm [shape: f32[2,8,256], index: 3, kind: output, shape index: {}]  }
   0x1   :  { %10 = vsyncpa [#allocation3 + $0x1], 0 }
   0x2   :  { %11 = vsyncpa [#allocation4], 0 }
   0x3   :  { %13 = vsyncpa [#allocation4 + $0x1], 0  ;;  %s656_s12 = smov 0   ;;  %s658_s13 = smov 0  }
   0x4   :  { %s660_s14 = smov 0   ;;  %s662_s15 = smov 0  }
   0x5 LB: > { %s677_s16 = sadd.s32 4294967295, %s630_s15   ;;  %s453_s17 = sadd.s32 4294967294, %s630_s15   ;;  %s630_s15 = sphi %s662_s15, %s845_s15   ;;  %s626_s14 = sphi %s660_s14, %s844_s14   ;;  %s622_s13 = sphi %s658_s13, %s843_s13   ;;  %s618_s12 = sphi %s656_s12, %s842_s12  }
   0x6   : > { %s681_s18 = sadd.s32 1, %s630_s15   ;;  %s26_s19 = sadd.s32 1, %s626_s14 }
   0x7   : > { %s23_s20 = ssub.s32 %s630_s15, %s681_s18  ;;  %p33_p0 = scmp.ne.s32.totalorder %s626_s14, %s622_s13 }
   0x8   : > { %p24_p1 = scmp.eq.s32.totalorder %s23_s20, 0  ;;  %p34_p2 = scmp.eq.s32.totalorder %s630_s15, 0 }
   0x9   : > { %p39_p3 = scmp.ne.s32.totalorder %s622_s13, %s618_s12  ;;  %p40_p4 = scmp.eq.s32.totalorder %s677_s16, 0 }
   0xa   : > { %s693_s21 = scalar_select %p24_p1, %s626_s14, %s26_s19  }
   0xb   : > { %p695_p5 = por %p34_p2, %p33_p0  ;;  %p699_p6 = por %p40_p4, %p39_p3 }
   0xc   : > { %p105_p7 = scmp.eq.s32.totalorder %s677_s16, 1  ;;  %p111_p8 = scmp.eq.s32.totalorder %s453_s17, 1 }
   0xd   : > { %p498_p10 = scmp.lt.s32.totalorder %s630_s15, 2  ;;  %s137_s26 = sand.u32 1, %s626_s14  }
   0xe   : > { %p706_p11 = por %p105_p7, %p33_p0  ;;  %p710_p12 = por %p111_p8, %p39_p3 }
   0xf   : > { %s470_s27 = sshll.u32 %s630_s15, 8  ;;  %s456_s28 = sshll.u32 %s137_s26, 4 }
  0x10   : > { %s834_s24 = scalar_select %p706_p11, 1, 0 }
  0x11   : > { %s835_s25 = scalar_select %p710_p12, 1, 0 }
  0x12   : > { %s719_s4 = scalar_lea.hbm %s827_s0, %s470_s27  ;;  %s141_s5 = scalar_lea.vmem [#allocation2], %s456_s28 }
  0x13   : > { %s149_s6 = sshll.u32 %s141_s5, 4  ;;  %p723_p13 = pnand %p498_p10, %p695_p5  ;;  %s727_s6 = int_to_ptr.vmem [resolvable:$true] %s149_s6 }
  0x14   : > { %s138_s8 = scalar_lea.sflag [#allocation3], %s137_s26  ;;  %s534_s9 = scalar_lea.hbm %s719_s4, 256 }
  0x15   : > { %p535_p2 = scmp.ne.s32.totalorder %s719_s4, %s534_s9  ;;  %p536_p3 = pneg %p723_p13 }
  0x16   : > { %s539_s17 = scalar_lea.hbm %s827_s0, 512  ;;  %p540_p5 = scmp.lt.u32.totalorder %s719_s4, %s827_s0 }
  0x17   : > { %p537_p4 = pnand %p536_p3, %p535_p2  ;;  %p541_p8 = scmp.lt.u32.totalorder %s539_s17, %s534_s9 }
  0x18   : > { %p543_p9 = scmp.lt.u32.totalorder %s534_s9, %s719_s4 }
  0x19   : > { %p538_p7 = pneg %p537_p4  ;;  %p542_p10 = por %p541_p8, %p540_p5 }
  0x1b   : > { %p544_p0 = por %p543_p9, %p542_p10 }
  0x1d   : > { %p545_p1 = pnand %p544_p0, %p538_p7 }
  0x1f   : > { %548 = shalt.err (!%p545_p1)
}
  0x20   : > { %s549_s22 = scalar_lea.vmem %s727_s6, 256  ;;  %s632_s26 = smov [#allocation2]  }
  0x21   : > { %p550_p2 = scmp.ne.s32.totalorder %s727_s6, %s549_s22  ;;  %s554_s27 = sshll.u32 %s632_s26, 4  ;;  %s555_s27 = int_to_ptr.vmem [resolvable:$false] %s554_s27 }
  0x22   : > { %s556_s28 = scalar_lea.vmem %s555_s27, 512  ;;  %p557_p11 = scmp.lt.s32.totalorder %s727_s6, %s555_s27 }
  0x23   : > { %p552_p4 = pnand %p550_p2, %p536_p3  ;;  %p558_p5 = scmp.lt.s32.totalorder %s556_s28, %s549_s22 }
  0x25   : > { %p553_p12 = pneg %p552_p4  ;;  %p559_p8 = por %p558_p5, %p557_p11 }
  0x27   : > { %p560_p9 = pnand %p559_p8, %p553_p12 }
  0x29   : > { %563 = shalt.err (!%p560_p9)
}
  0x2a   : > { %493 = dma.hbm_to_vmem [thread:$0]  (!%p723_p13), %s719_s4, 256, %s727_s6, %s138_s8  }
  0x2b   : > { %p837_p0 = scmp.lt.s32.totalorder %s630_s15, 3  ;;  %p838_p1 = scmp.ge.s32.totalorder %s630_s15, 1 }
  0x2d   : > { %p155_p3 = pnand %p838_p1, %p837_p0 }
  0x2e   : > { %s761_s29 = sand.u32 (!%p155_p3), 1, %s622_s13  }
  0x2f   : > { %158 = sbr.rel (%p155_p3) target bundleno = 771 (0x303), region = 32  ;;  %s460_s30 = sshll.u32 (!%p155_p3), %s761_s29, 4 }
  0x30   : > { %s161_s5 = scalar_lea.sflag (!%p155_p3), [#allocation3], %s761_s29  ;;  %s164_s7 = scalar_lea.vmem (!%p155_p3), [#allocation2], %s460_s30 }
  0x36   : > { %609 = dma.done.wait (%p699_p6), %s161_s5, 256  }
  0x37   : > { %611 = vsyncadd (%p699_p6), %s161_s5, 4294967040  ;;  %v187_v0 = vld [vmem:[%s164_s7] sm:$0xff]  ;;  %v188_v1 = vld [vmem:[%s164_s7 + $0x8] sm:$0xff]  ;;  %v633_v3 = vmov 0.0   ;;  %vm634_vm0 = vmmov 0   ;;  %v195_v5 = vlaneseq  ;;  %vm201_vm1 = vcmask 64512  }
  0x38   : > { %v189_v2 = vadd.f32 %v188_v1, %v187_v0  ;;  %476 = vmatprep.subr.mxu0 %v633_v3  ;;  %v193_v4 = vld [vmem:[%s828_s1] sm:$0xff]  ;;  %481 = vmatprep.subr.mxu1 %v633_v3  ;;  %vm280_vm2 = vcmask 1041408   ;;  %vm276_vm3 = vcmask 15360   ;;  %s471_s9 = sshll.u32 %s677_s16, 8  ;;  %s186_s10 = scalar_lea.vmem [#allocation5], %s460_s30 }
  0x39   : > { %477 = vmatpush3.msra.mxu0 %v193_v4  ;;  %478 = vmatprep.mubr.msk.f32.mxu0 %vm634_vm0, %v633_v3  ;;  %v196_v6 = vand.u32 127, %v195_v5  ;;  %v198_v7 = vshrl.u32 %v195_v5, 7  ;;  %v275_v12 = vld [vmem:[%s829_s2] sm:$0x3]  ;;  %s383_s11 = sshll.u32 %s186_s10, 4  ;;  %s783_s20 = scalar_lea.hbm %s830_s3, %s471_s9  ;;  %s785_s11 = int_to_ptr.vmem [resolvable:$true] %s383_s11 }
  0x3a   : > { %190 = vadd.xlane.f32.xlu0 %v189_v2  ;;  %483 = vmatprep.mubr.msk.f32.mxu1 %vm634_vm0, %v633_v3  ;;  %s369_s22 = scalar_lea.sflag [#allocation4], %s761_s29  ;;  %s564_s16 = scalar_lea.vmem %s785_s11, 256 }
  0x3b   : > { %v199_v8 = vsub.s32 %v196_v6, %v198_v7  ;;  %482 = vmatpush3.msk.msra.mxu1 %vm280_vm2, %v275_v12  ;;  %v359_v21 = vsub.s32 0, %v198_v7  ;;  %p565_p6 = scmp.ne.s32.totalorder %s785_s11, %s564_s16  ;;  %p839_p11 = scmp.ne.s32.totalorder %s834_s24, 0 }
  0x3c   : > { %s635_s26 = smov [#allocation5]  }
  0x3d   : > { %p566_p12 = pnand %p565_p6, %p839_p11  ;;  %s568_s27 = sshll.u32 %s635_s26, 4  ;;  %s569_s27 = int_to_ptr.vmem [resolvable:$false] %s568_s27 }
  0x3e   : > { %s570_s28 = scalar_lea.vmem %s569_s27, 512  ;;  %p571_p7 = scmp.lt.s32.totalorder %s785_s11, %s569_s27 }
  0x3f   : > { %p567_p13 = pneg %p566_p12  ;;  %p572_p10 = scmp.lt.s32.totalorder %s570_s28, %s564_s16 }
  0x41   : > { %p573_p2 = por %p572_p10, %p571_p7 }
  0x43   : > { %p574_p4 = pnand %p573_p2, %p567_p13 }
  0xc7   : > { %v191_v9 = vpop.xlane.xlu0 %190 }
  0xc8   : > { %v192_v10 = vmul.f32 0.00390625, %v191_v9 }
  0xca   : > { %v200_v11 = vrot.slane %v192_v10, %v199_v8 }
  0xcc   : > { %479 = vmatmul.mubr.msk.f32.vlgmr.msra.gmra.mrb[0].mxu0 %vm201_vm1, %v200_v11 }
 0x19f   : > { %v270_v13 = vpop.f32.mrb[0].mxu0 }
 0x1a0   : > { %v274_v14 = vmax.f32 %v270_v13, 0.0  ;;  %v480_v15 = vpop.f32.mrb[1].mxu0 }
 0x1a2   : > { %484 = vmatmul.mubr.msk.f32.vlgmr.msra.gmra.mrb[0].mxu1 %vm276_vm3, %v274_v14 }
 0x275   : > { %v350_v16 = vpop.f32.mrb[0].mxu1 }
 0x276   : > { %v351_v17 = vadd.f32 3.0, %v350_v16  ;;  %v485_v18 = vpop.f32.mrb[1].mxu1 }
 0x278   : > { %v354_v19 = vmax.f32 %v351_v17, 0.0 }
 0x27a   : > { %v355_v20 = vmin.f32 %v354_v19, 6.0 }
 0x27c   : > { %v356_v22 = vmul.f32 0.16666667, %v355_v20 }
 0x27e   : > { %v360_v23 = vrot.slane %v356_v22, %v359_v21 }
 0x280   : > { %362 = vbcast.lane.b32.xlu0 %v360_v23, 256 }
 0x2f2   : > { %v363_v24 = vpop.permute.xlu0 %362 }
 0x2f3   : > { %v364_v25 = vmul.f32 %v363_v24, %v187_v0  ;;  %v365_v26 = vmul.f32 %v363_v24, %v188_v1 }
 0x2f5   : > { %366 = vst [vmem:[%s186_s10] sm:$0xff] %v364_v25  ;;  %367 = vst [vmem:[%s186_s10 + $0x8] sm:$0xff] %v365_v26 }
 0x2f6   : > { %577 = shalt.err (!%p574_p4)
}
 0x2f7   : > { %s578_s29 = scalar_lea.hbm %s783_s20, 256  ;;  %s582_s7 = scalar_lea.hbm %s830_s3, 512 }
 0x2f8   : > { %p579_p5 = scmp.ne.s32.totalorder %s783_s20, %s578_s29  ;;  %p583_p0 = scmp.lt.u32.totalorder %s783_s20, %s830_s3 }
 0x2f9   : > { %p584_p1 = scmp.lt.u32.totalorder %s582_s7, %s578_s29  ;;  %p586_p6 = scmp.lt.u32.totalorder %s578_s29, %s783_s20 }
 0x2fa   : > { %p580_p8 = pnand %p579_p5, %p839_p11 }
 0x2fb   : > { %p585_p3 = por %p584_p1, %p583_p0 }
 0x2fc   : > { %p581_p9 = pneg %p580_p8 }
 0x2fd   : > { %p587_p12 = por %p586_p6, %p585_p3 }
 0x2ff   : > { %p588_p13 = pnand %p587_p12, %p581_p9 }
 0x301   : > { %591 = shalt.err (!%p588_p13)
}
 0x302   : > { %488 = dma.vmem_to_hbm [thread:$0]  (%p839_p11), %s785_s11, 256, %s783_s20, %s369_s22  }
 0x303 PF: > { %s395_s23 = sand.u32 1, %s618_s12   ;;  %p840_p7 = scmp.ne.s32.totalorder %s835_s25, 0 }
 0x304   : > { %p841_p10 = scmp.ge.s32.totalorder %s630_s15, 2  ;;  %s396_s8 = scalar_lea.sflag [#allocation4], %s395_s23 }
 0x306   : > { %p495_p2 = pnand %p841_p10, %p840_p7 }
 0x308   : > { %613 = dma.done.wait (!%p495_p2), %s396_s8, 256  }
 0x309   : > { %615 = vsyncadd (!%p495_p2), %s396_s8, 4294967040  ;;  %p16_p4 = scmp.ge.s32.totalorder %s681_s18, 4   ;;  %s842_s12 = smov %s622_s13 }
 0x30a   : > { %s843_s13 = smov %s626_s14  ;;  %s844_s14 = smov %s693_s21 }
 0x30b   : > { %s845_s15 = smov %s681_s18  ;;  %18 = sbr.rel (!%p16_p4) target bundleno = 5 (0x5), region = 77 }
 0x312   :  { %401 = vsyncpa [#allocation3], 1 }
 0x313   :  { %403 = vsyncpa [#allocation3 + $0x1], 1 }
 0x314   :  { %404 = vsyncpa [#allocation4], 1 }
 0x315   :  { %406 = vsyncpa [#allocation4 + $0x1], 1 }

</bundles_post_ra>
